<compile_context>
chip_gen: v6e
topology: v6e:2x2x1
jax: 0.10.0
libtpu: 0.0.40
codegen_flags: <defaults>
</compile_context>

<pallas_src>
import functools

import jax
import jax.numpy as jnp
from jax.experimental import pallas as pl
from jax.experimental.pallas import tpu as pltpu


def _round_up(x, m):
    return ((x + m - 1) // m) * m


def _flatten_2d_shape(shape):
    """Fold leading dims into rows; 1-D state becomes a single lane-dense row."""
    if len(shape) == 0:
        return (1, 1)
    if len(shape) == 1:
        return (1, int(shape[0]))
    rows = 1
    for s in shape[:-1]:
        rows *= int(s)
    return (rows, int(shape[-1]))


def _choose_tile_rows(n, d, itemsize):
    """Rows per block: multi-MiB blocks, >=2 grid steps whenever there is work.

    ~2 MiB per block -> 2 inputs + 2 outputs, double-buffered, is ~16 MiB of
    VMEM: comfortably inside v7x's 64 MiB and v5e/v6e's 128 MiB while being far
    past the measured ~512-row roofline knee for mem-bound elementwise ops.
    """
    row_bytes = max(1, d * itemsize)
    budget = max(8, ((2 * 1024 * 1024) // row_bytes) // 8 * 8)
    if n <= budget:
        if n >= 16:
            # Split roughly in half (multiple of 8 sublanes) so the grid has 2
            # steps and both v7x TensorCores get a share of the stream.
            return min(n, _round_up(_round_up(n, 2) // 2, 8))
        # Tiny state: a single whole-array block (block dim == full dim is legal).
        return n
    return budget


def _ema_kernel(scalars_ref, hidden_ref, value_ref, new_hidden_ref, avg_ref):
    # scalars_ref (SMEM, f32[2]): [1 - decay, 1 / (1 - decay**counter)]
    one_minus_decay = scalars_ref[0]
    inv_bias_corr = scalars_ref[1]

    # Compute in f32 regardless of storage dtype.
    h = hidden_ref[...].astype(jnp.float32)
    v = value_ref[...].astype(jnp.float32)
    new_h = h - (h - v) * one_minus_decay                 # hidden update
    new_hidden_ref[...] = new_h.astype(new_hidden_ref.dtype)
    avg_ref[...] = (new_h * inv_bias_corr).astype(avg_ref.dtype)


@functools.partial(jax.jit, static_argnames=("tile_rows",), donate_argnums=(0,))
def ema_forward(hidden, value, scalars, *, tile_rows):
    """Returns (new_hidden, average). `hidden` (2-D f32) is donated / aliased."""
    n, d = hidden.shape
    value2d = value.reshape(n, d)            # free inside XLA, fuses with the call

    grid = (pl.cdiv(n, tile_rows),)          # partial last block handled by Pallas
    dense_spec = pl.BlockSpec((tile_rows, d), lambda i: (i, 0))

    # Explicit scoped-VMEM budget sized to the chosen tile (4 streams x 2 buffers
    # plus slack), clamped so it also fits v7x's 64 MiB physical VMEM.
    tile_bytes = tile_rows * d * 4
    vmem_limit = int(min(48 << 20, max(16 << 20, 10 * tile_bytes)))

    new_hidden, average = pl.pallas_call(
        _ema_kernel,
        out_shape=(
            jax.ShapeDtypeStruct((n, d), hidden.dtype),   # new hidden (aliased)
            jax.ShapeDtypeStruct((n, d), hidden.dtype),   # bias-corrected average
        ),
        grid=grid,
        in_specs=[
            pl.BlockSpec(memory_space=pltpu.MemorySpace.SMEM),  # scalars
            dense_spec,                                         # hidden
            dense_spec,                                         # value
        ],
        out_specs=(dense_spec, dense_spec),
        input_output_aliases={1: 0},          # hidden (input 1) -> new_hidden (out 0)
        compiler_params=pltpu.CompilerParams(
            dimension_semantics=("parallel",),
            vmem_limit_bytes=vmem_limit),
    )(scalars, hidden, value2d)

    return new_hidden, average.reshape(value.shape)


class ExponentialMovingAverage:
    """Functional-state JAX port of the PyTorch module (arbitrary-shape EMA state)."""

    def __init__(self, init_value, decay):
        self.decay = float(decay)
        self.counter = 0
        self._shape = tuple(init_value.shape)
        n, d = _flatten_2d_shape(self._shape)
        # Persistent accumulator in float32: a low-precision accumulator loses
        # accuracy across many EMA steps.
        self.hidden = jnp.zeros((n, d), dtype=jnp.float32)
        self._tile_rows = _choose_tile_rows(n, d, 4)

    def __call__(self, value):
        self.counter += 1
        one_minus_decay = 1.0 - self.decay
        inv_bias_corr = 1.0 / (1.0 - self.decay ** self.counter)
        scalars = jnp.array([one_minus_decay, inv_bias_corr], dtype=jnp.float32)
        new_hidden, average = ema_forward(
            self.hidden, value, scalars, tile_rows=self._tile_rows)
        self.hidden = new_hidden              # old buffer was donated / aliased
        return average

    @property
    def hidden_state(self):
        return self.hidden.reshape(self._shape)


def _reference(hidden, value, decay, counter):
    new_hidden = hidden - (hidden - value) * (1.0 - decay)
    average = new_hidden / (1.0 - decay ** counter)
    return new_hidden, average


if __name__ == "__main__":
    key = jax.random.PRNGKey(0)
    decay = 0.99

    # Case 1: codebook-shaped 2-D EMA state (embed_avg in a VQ-VAE).
    num_codes, dim = 512, 128
    ema2d = ExponentialMovingAverage(jnp.zeros((num_codes, dim), jnp.float32), decay)
    ref_hidden2d = jnp.zeros((num_codes, dim), jnp.float32)

    # Case 2: 1-D EMA state (cluster_size in a VQ-VAE).
    ema1d = ExponentialMovingAverage(jnp.zeros((num_codes,), jnp.float32), decay)
    ref_hidden1d = jnp.zeros((num_codes,), jnp.float32)

    for step in range(3):
        key, k2, k1 = jax.random.split(key, 3)
        value2d = jax.random.normal(k2, (num_codes, dim), dtype=jnp.float32)
        value1d = jax.random.normal(k1, (num_codes,), dtype=jnp.float32)

        avg2d = jax.block_until_ready(ema2d(value2d))
        avg1d = jax.block_until_ready(ema1d(value1d))

        ref_hidden2d, ref_avg2d = _reference(ref_hidden2d, value2d, decay, step + 1)
        ref_hidden1d, ref_avg1d = _reference(ref_hidden1d, value1d, decay, step + 1)

        assert jnp.allclose(avg2d, ref_avg2d, rtol=1e-5, atol=1e-5), f"2d avg mismatch @ {step}"
        assert jnp.allclose(ema2d.hidden_state, ref_hidden2d, rtol=1e-5, atol=1e-5)
        assert jnp.allclose(avg1d, ref_avg1d, rtol=1e-5, atol=1e-5), f"1d avg mismatch @ {step}"
        assert jnp.allclose(ema1d.hidden_state, ref_hidden1d, rtol=1e-5, atol=1e-5)

    print("KERNEL_OK")
</pallas_src>

<mosaic_0001>
module attributes {stable_mosaic.version = 11 : i64} {
  func.func @_ema_kernel(%arg0: i32, %arg1: memref<2xf32, #tpu.memory_space<smem>>, %arg2: memref<256x128xf32, #tpu.memory_space<vmem>>, %arg3: memref<256x128xf32, #tpu.memory_space<vmem>>, %arg4: memref<256x128xf32, #tpu.memory_space<vmem>>, %arg5: memref<256x128xf32, #tpu.memory_space<vmem>>) attributes {dimension_semantics = [#tpu.dimension_semantics<parallel>], iteration_bounds = array<i64: 2>, scalar_prefetch = 0 : i64, scratch_operands = 0 : i64, tpu.core_type = #tpu.core_type<tc>, window_params = [{transform_indices = @transform_0, window_bounds = array<i64: 2>}, {transform_indices = @transform_1, window_bounds = array<i64: 256, 128>}, {transform_indices = @transform_2, window_bounds = array<i64: 256, 128>}, {transform_indices = @transform_3, window_bounds = array<i64: 256, 128>}, {transform_indices = @transform_4, window_bounds = array<i64: 256, 128>}]} {
    %c0 = arith.constant 0 : index
    %0 = memref.load %arg1[%c0] : memref<2xf32, #tpu.memory_space<smem>>
    %c1 = arith.constant 1 : index
    %1 = memref.load %arg1[%c1] : memref<2xf32, #tpu.memory_space<smem>>
    %c0_0 = arith.constant 0 : index
    %c0_1 = arith.constant 0 : index
    %2 = vector.load %arg2[%c0_0, %c0_1] : memref<256x128xf32, #tpu.memory_space<vmem>>, vector<256x128xf32>
    %c0_2 = arith.constant 0 : index
    %c0_3 = arith.constant 0 : index
    %3 = vector.load %arg3[%c0_2, %c0_3] : memref<256x128xf32, #tpu.memory_space<vmem>>, vector<256x128xf32>
    %4 = arith.subf %2, %3 : vector<256x128xf32>
    %5 = vector.broadcast %0 : f32 to vector<256x128xf32>
    %6 = arith.mulf %4, %5 : vector<256x128xf32>
    %7 = arith.subf %2, %6 : vector<256x128xf32>
    %c0_4 = arith.constant 0 : index
    %c0_5 = arith.constant 0 : index
    %8 = vector.load %arg4[%c0_4, %c0_5] : memref<256x128xf32, #tpu.memory_space<vmem>>, vector<256x128xf32>
    tpu.vector_store %arg4[%c0_4, %c0_5], %7 {strides = array<i32>} : memref<256x128xf32, #tpu.memory_space<vmem>>, vector<256x128xf32>,
    %9 = vector.broadcast %1 : f32 to vector<256x128xf32>
    %10 = arith.mulf %7, %9 : vector<256x128xf32>
    %c0_6 = arith.constant 0 : index
    %c0_7 = arith.constant 0 : index
    %11 = vector.load %arg5[%c0_6, %c0_7] : memref<256x128xf32, #tpu.memory_space<vmem>>, vector<256x128xf32>
    tpu.vector_store %arg5[%c0_6, %c0_7], %10 {strides = array<i32>} : memref<256x128xf32, #tpu.memory_space<vmem>>, vector<256x128xf32>,
    return
  }
  func.func @transform_0(%arg0: i32) -> i32 {
    %c0_i32 = arith.constant 0 : i32
    %c0_i32_0 = arith.constant 0 : i32
    return %c0_i32 : i32
  }
  func.func @transform_1(%arg0: i32) -> (i32, i32) {
    %c0_i32 = arith.constant 0 : i32
    %c0_i32_0 = arith.constant 0 : i32
    return %arg0, %c0_i32 : i32, i32
  }
  func.func @transform_2(%arg0: i32) -> (i32, i32) {
    %c0_i32 = arith.constant 0 : i32
    %c0_i32_0 = arith.constant 0 : i32
    return %arg0, %c0_i32 : i32, i32
  }
  func.func @transform_3(%arg0: i32) -> (i32, i32) {
    %c0_i32 = arith.constant 0 : i32
    %c0_i32_0 = arith.constant 0 : i32
    return %arg0, %c0_i32 : i32, i32
  }
  func.func @transform_4(%arg0: i32) -> (i32, i32) {
    %c0_i32 = arith.constant 0 : i32
    %c0_i32_0 = arith.constant 0 : i32
    return %arg0, %c0_i32 : i32, i32
  }
}

</mosaic_0001>

<bundles_post_ra>
// kernel: ema_forward.1
= control target key start
LH: loop header
LB: loop body
LE: loop exit
PB: predicated region body
PF: predicated region fallthrough
CT: control target
= control target key end

     0   :  { %s1681_s0 = inlined_call_operand.vmem [shape: f32[2], index: 0, kind: input, shape index: {}]   ;;  %s1682_s1 = inlined_call_operand.hbm [shape: f32[512,128], index: 1, kind: input, shape index: {}, may-alias: {1,3}]   ;;  %s1683_s2 = inlined_call_operand.hbm [shape: f32[512,128], index: 2, kind: input, shape index: {}]   ;;  %s1684_s3 = inlined_call_operand.hbm [shape: f32[512,128], index: 3, kind: output, shape index: {0}, may-alias: {1,3}]   ;;  %s1685_s4 = inlined_call_operand.hbm [shape: f32[512,128], index: 4, kind: output, shape index: {1}]  }
   0x1   :  { %1689 = sst [smem:[#allocation17_spill]] %s1681_s0 }
   0x2   :  { %10 = vsyncpa [#allocation5], 0 }
   0x3   :  { %11 = vsyncpa [#allocation3], 0 }
   0x4   :  { %13 = vsyncpa [#allocation3 + $0x1], 0 }
   0x5   :  { %14 = vsyncpa [#allocation8], 0 }
   0x6   :  { %16 = vsyncpa [#allocation8 + $0x1], 0 }
   0x7   :  { %17 = vsyncpa [#allocation4], 0 }
   0x8   :  { %19 = vsyncpa [#allocation4 + $0x1], 0 }
   0x9   :  { %20 = vsyncpa [#allocation11], 0 }
   0xa   :  { %22 = vsyncpa [#allocation11 + $0x1], 0  ;;  %s1029_s15 = smov 0   ;;  %s1031_s16 = smov 0  }
   0xb   :  { %s1033_s17 = smov 0   ;;  %s1035_s18 = smov 0  }
   0xc LB: > { %s1050_s19 = sadd.s32 4294967295, %s993_s18   ;;  %s720_s20 = sadd.s32 4294967294, %s993_s18   ;;  %s993_s18 = sphi %s1035_s18, %s1707_s18   ;;  %s989_s17 = sphi %s1033_s17, %s1706_s17   ;;  %s985_s16 = sphi %s1031_s16, %s1705_s16   ;;  %s981_s15 = sphi %s1029_s15, %s1704_s15  }
   0xd   : > { %s1054_s21 = sadd.s32 1, %s993_s18   ;;  %s56_s22 = sadd.s32 1, %s989_s17 }
   0xe   : > { %s53_s23 = ssub.s32 %s993_s18, %s1054_s21  ;;  %p63_p0 = scmp.ne.s32.totalorder %s989_s17, %s985_s16 }
   0xf   : > { %p54_p1 = scmp.eq.s32.totalorder %s53_s23, 0  ;;  %p64_p2 = scmp.eq.s32.totalorder %s993_s18, 0 }
  0x10   : > { %p69_p3 = scmp.ne.s32.totalorder %s985_s16, %s981_s15  ;;  %p1686_p4 = scmp.eq.s32.totalorder %s1050_s19, 0 }
  0x11   : > { %s1066_s24 = scalar_select %p54_p1, %s989_s17, %s56_s22  }
  0x12   : > { %p1068_p5 = por %p64_p2, %p63_p0  ;;  %p1074_p6 = por %p1686_p4, %p69_p3 }
  0x13   : > { %p119_p7 = scmp.eq.s32.totalorder %s1050_s19, 1  ;;  %p125_p8 = scmp.eq.s32.totalorder %s720_s20, 1 }
  0x14   : > { %s1691_s26 = scalar_select %p1074_p6, 1, 0 }
  0x15   : > { %p721_p9 = scmp.ge.s32.totalorder %s993_s18, 1  ;;  %p158_p10 = scmp.lt.s32.totalorder %s993_s18, 3 }
  0x16   : > { %p1081_p11 = por %p119_p7, %p63_p0  ;;  %p1085_p12 = por %p125_p8, %p69_p3 }
  0x17   : > { %p1089_p13 = pnand %p721_p9, %p158_p10  ;;  %s1695_s0 = sld [smem:[#allocation17_spill]] }
  0x18   : > { %s1692_s27 = scalar_select %p1081_p11, 1, 0 }
  0x19   : > { %s1693_s28 = scalar_select %p1085_p12, 1, 0 }
  0x1a   : > { %p761_p1 = pneg %p1089_p13  ;;  %p780_p2 = scmp.lt.s32.totalorder %s993_s18, 2 }
  0x1b   : > { %s1107_s8 = sand.u32 1, %s989_s17  }
  0x1c   : > { %p1102_p7 = pnand %p761_p1, %p1686_p4  ;;  %p1111_p3 = pnand %p780_p2, %p1068_p5 }
  0x1d   : > { %s171_s6 = sshll.u32 %s1695_s0, 4  ;;  %s724_s10 = sshll.u32 %s1107_s8, 8  ;;  %s172_s6 = int_to_ptr.vmem [resolvable:$true] %s171_s6 }
  0x1e   : > { %s820_s11 = scalar_lea.vmem %s172_s6, 16  ;;  %p822_p9 = pneg %p1102_p7 }
  0x1f   : > { %p821_p8 = scmp.ne.s32.totalorder %s172_s6, %s820_s11  ;;  %p828_p1 = scmp.lt.s32.totalorder %s172_s6, %s172_s6 }
  0x20   : > { %p829_p4 = scmp.lt.s32.totalorder %s820_s11, %s820_s11 }
  0x21   : > { %p823_p10 = pnand %p822_p9, %p821_p8 }
  0x22   : > { %p830_p12 = por %p829_p4, %p828_p1 }
  0x23   : > { %p824_p0 = pneg %p823_p10 }
  0x25   : > { %p831_p11 = pnand %p830_p12, %p824_p0 }
  0x27   : > { %834 = shalt.err (!%p831_p11)
}
  0x28   : > { %s995_s12 = smov [#allocation2]   ;;  %s745_s13 = sshll.u32 %s993_s18, 12 }
  0x29   : > { %764 = dma.vmem_to_smem (!%p1102_p7), %s172_s6, 16, %s995_s12, [#allocation5]  }
  0x2a   : > { %s186_s14 = scalar_lea.vmem [#allocation6], %s724_s10  ;;  %s1128_s25 = scalar_lea.hbm %s1682_s1, %s745_s13 }
  0x2b   : > { %s193_s20 = sshll.u32 %s186_s14, 4  ;;  %s183_s30 = scalar_lea.sflag [#allocation3], %s1107_s8  ;;  %s1130_s20 = int_to_ptr.vmem [resolvable:$true] %s193_s20 }
  0x2c   : > { %s835_s5 = scalar_lea.hbm %s1128_s25, 4096  ;;  %p837_p5 = pneg %p1111_p3 }
  0x2d   : > { %p836_p4 = scmp.ne.s32.totalorder %s1128_s25, %s835_s5  ;;  %s840_s11 = scalar_lea.hbm %s1682_s1, 8192 }
  0x2e   : > { %p841_p0 = scmp.lt.s32.totalorder %s1128_s25, %s1682_s1  ;;  %p842_p2 = scmp.lt.s32.totalorder %s840_s11, %s835_s5 }
  0x2f   : > { %p838_p11 = pnand %p837_p5, %p836_p4 }
  0x30   : > { %p843_p7 = por %p842_p2, %p841_p0 }
  0x31   : > { %p839_p12 = pneg %p838_p11 }
  0x33   : > { %p844_p8 = pnand %p843_p7, %p839_p12 }
  0x35   : > { %847 = shalt.err (!%p844_p8)
}
  0x36   : > { %s848_s22 = scalar_lea.vmem %s1130_s20, 4096  ;;  %s996_s23 = smov [#allocation6]  }
  0x37   : > { %p849_p9 = scmp.ne.s32.totalorder %s1130_s20, %s848_s22  ;;  %s853_s6 = sshll.u32 %s996_s23, 4  ;;  %s854_s6 = int_to_ptr.vmem [resolvable:$false] %s853_s6 }
  0x38   : > { %s855_s7 = scalar_lea.vmem %s854_s6, 8192  ;;  %p856_p4 = scmp.lt.s32.totalorder %s1130_s20, %s854_s6 }
  0x39   : > { %p851_p10 = pnand %p849_p9, %p837_p5  ;;  %p857_p11 = scmp.lt.s32.totalorder %s855_s7, %s848_s22 }
  0x3b   : > { %p852_p1 = pneg %p851_p10  ;;  %p858_p6 = por %p857_p11, %p856_p4 }
  0x3d   : > { %p859_p0 = pnand %p858_p6, %p852_p1 }
  0x3f   : > { %862 = shalt.err (!%p859_p0)
}
  0x40   : > { %s997_s5 = smov 128   ;;  %s998_s11 = smov 8  }
  0x41   : > { %768 = dma.hbm_to_vmem [thread:$0]  (!%p1111_p3), %s1128_s25, 4096, %s1130_s20, %s183_s30, %s997_s5, %s997_s5, %s998_s11  }
  0x42   : > { %s1167_s22 = scalar_lea.hbm %s1683_s2, %s745_s13  ;;  %s207_s23 = scalar_lea.vmem [#allocation7], %s724_s10 }
  0x43   : > { %s214_s6 = sshll.u32 %s207_s23, 4  ;;  %s204_s7 = scalar_lea.sflag [#allocation8], %s1107_s8  ;;  %s1171_s6 = int_to_ptr.vmem [resolvable:$true] %s214_s6 }
  0x44   : > { %s863_s0 = scalar_lea.hbm %s1167_s22, 4096  ;;  %s868_s13 = scalar_lea.hbm %s1683_s2, 8192 }
  0x45   : > { %p864_p6 = scmp.ne.s32.totalorder %s1167_s22, %s863_s0  ;;  %p869_p7 = scmp.lt.s32.totalorder %s1167_s22, %s1683_s2 }
  0x46   : > { %p870_p8 = scmp.lt.s32.totalorder %s868_s13, %s863_s0 }
  0x47   : > { %p866_p12 = pnand %p864_p6, %p837_p5 }
  0x48   : > { %p871_p9 = por %p870_p8, %p869_p7 }
  0x49   : > { %p867_p2 = pneg %p866_p12 }
  0x4b   : > { %p872_p10 = pnand %p871_p9, %p867_p2 }
  0x4d   : > { %875 = shalt.err (!%p872_p10)
}
  0x4e   : > { %s876_s8 = scalar_lea.vmem %s1171_s6, 4096  ;;  %s999_s10 = smov [#allocation7]  }
  0x4f   : > { %p877_p1 = scmp.ne.s32.totalorder %s1171_s6, %s876_s8  ;;  %s881_s14 = sshll.u32 %s999_s10, 4  ;;  %s882_s14 = int_to_ptr.vmem [resolvable:$false] %s881_s14 }
  0x50   : > { %s883_s23 = scalar_lea.vmem %s882_s14, 8192  ;;  %p884_p0 = scmp.lt.s32.totalorder %s1171_s6, %s882_s14 }
  0x51   : > { %p879_p4 = pnand %p877_p1, %p837_p5  ;;  %p885_p6 = scmp.lt.s32.totalorder %s883_s23, %s876_s8 }
  0x53   : > { %p880_p11 = pneg %p879_p4  ;;  %p886_p12 = por %p885_p6, %p884_p0 }
  0x55   : > { %p887_p7 = pnand %p886_p12, %p880_p11 }
  0x57   : > { %890 = shalt.err (!%p887_p7)
}
  0x58   : > { %771 = dma.hbm_to_vmem [thread:$0]  (!%p1111_p3), %s1167_s22, 4096, %s1171_s6, %s204_s7, %s997_s5, %s997_s5, %s998_s11  }
  0x59   : > { %226 = sbr.rel (%p1089_p13) target bundleno = 178 (0xb2), region = 32  ;;  %p1698_p5 = scmp.eq.s32.totalorder (!%p1089_p13), %s1050_s19, 0 }
  0x5e   : > { %960 = dma.done.wait (%p1698_p5), [#allocation5], 16   ;;  %p1699_p2 = pmov %p1698_p5 }
  0x5f   : > { %s1206_s0 = sand.u32 1, %s985_s16   ;;  %p1700_p3 = scmp.ne.s32.totalorder %s1691_s26, 0 }
  0x60   : > { %962 = vsyncadd (%p1699_p2), [#allocation5], 4294967280  ;;  %s1209_s9 = sshll.u32 %s1206_s0, 8  ;;  %s233_s20 = scalar_lea.sflag [#allocation3], %s1206_s0 }
  0x61   : > { %s1213_s5 = scalar_lea.vmem [#allocation6], %s1209_s9 }
  0x62   : > { %964 = dma.done.wait (%p1700_p3), %s233_s20, 4096  }
  0x63   : > { %966 = vsyncadd (%p1700_p3), %s233_s20, 4294963200  ;;  %s242_s29 = scalar_lea.sflag [#allocation8], %s1206_s0  ;;  %s1221_s11 = scalar_lea.vmem [#allocation7], %s1209_s9 }
  0x64   : > { %968 = dma.done.wait (%p1700_p3), %s242_s29, 4096  }
  0x65   : > { %970 = vsyncadd (%p1700_p3), %s242_s29, 4294963200 }
  0x66   : > { %250 = sfence }
  0x67   : > { %s285_s22 = sld [smem:[#allocation2]]  ;;  %v287_v0 = vld [vmem:[%s1213_s5] sm:$0xff]  ;;  %v288_v2 = vld [vmem:[%s1213_s5 + $0x8] sm:$0xff]  ;;  %v289_v4 = vld [vmem:[%s1213_s5 + $0x10] sm:$0xff]  ;;  %s1292_s26 = scalar_lea.vmem [#allocation9], %s1209_s9 }
  0x68   : > { %v319_v1 = vld [vmem:[%s1221_s11] sm:$0xff]  ;;  %v320_v3 = vld [vmem:[%s1221_s11 + $0x8] sm:$0xff]  ;;  %v321_v5 = vld [vmem:[%s1221_s11 + $0x10] sm:$0xff]  ;;  %s1404_s6 = sld [smem:[#allocation2 + $0x1]]  ;;  %s747_s7 = sshll.u32 %s1050_s19, 12 }
  0x69   : > { %v290_v6 = vld [vmem:[%s1213_s5 + $0x18] sm:$0xff]  ;;  %v291_v8 = vld [vmem:[%s1213_s5 + $0x20] sm:$0xff]  ;;  %v351_v9 = vsub.f32 %v287_v0, %v319_v1  ;;  %v352_v10 = vsub.f32 %v288_v2, %v320_v3  ;;  %v353_v11 = vsub.f32 %v289_v4, %v321_v5  ;;  %v292_v14 = vld [vmem:[%s1213_s5 + $0x28] sm:$0xff]  ;;  %s564_s25 = sshll.u32 %s1292_s26, 4  ;;  %s1478_s12 = scalar_lea.hbm %s1684_s3, %s747_s7  ;;  %s1480_s25 = int_to_ptr.vmem [resolvable:$true] %s564_s25 }
  0x6a   : > { %v322_v7 = vld [vmem:[%s1221_s11 + $0x18] sm:$0xff]  ;;  %v323_v13 = vld [vmem:[%s1221_s11 + $0x20] sm:$0xff]  ;;  %v324_v15 = vld [vmem:[%s1221_s11 + $0x28] sm:$0xff]  ;;  %s1521_s8 = scalar_lea.vmem [#allocation10], %s1209_s9  ;;  %s546_s10 = scalar_lea.sflag [#allocation4], %s1206_s0 }
  0x6b   : > { %v354_v12 = vsub.f32 %v290_v6, %v322_v7  ;;  %v355_v16 = vsub.f32 %v291_v8, %v323_v13  ;;  %v356_v17 = vsub.f32 %v292_v14, %v324_v15  ;;  %v293_v18 = vld [vmem:[%s1213_s5 + $0x30] sm:$0xff]  ;;  %v294_v20 = vld [vmem:[%s1213_s5 + $0x38] sm:$0xff]  ;;  %v295_v23 = vld [vmem:[%s1213_s5 + $0x40] sm:$0xff]  ;;  %s891_s14 = scalar_lea.vmem %s1480_s25, 4096  ;;  %p1701_p8 = scmp.ne.s32.totalorder %s1692_s27, 0 }
  0x6c   : > { %v325_v19 = vld [vmem:[%s1221_s11 + $0x30] sm:$0xff]  ;;  %v326_v22 = vld [vmem:[%s1221_s11 + $0x38] sm:$0xff]  ;;  %v327_v24 = vld [vmem:[%s1221_s11 + $0x40] sm:$0xff]  ;;  %p892_p13 = scmp.ne.s32.totalorder %s1480_s25, %s891_s14  ;;  %s1000_s23 = smov [#allocation9]  }
  0x6d   : > { %v357_v21 = vsub.f32 %v293_v18, %v325_v19  ;;  %v1245_v25 = vstv %s285_s22  ;;  %v358_v26 = vsub.f32 %v294_v20, %v326_v22  ;;  %v359_v27 = vsub.f32 %v295_v23, %v327_v24  ;;  %v1248_v28 = vld [vmem:[%s1213_s5 + $0x48] sm:$0xff]  ;;  %v1252_v30 = vld [vmem:[%s1213_s5 + $0x50] sm:$0xff]  ;;  %v1260_v36 = vld [vmem:[%s1213_s5 + $0x58] sm:$0xff]  ;;  %s895_s9 = sshll.u32 %s1000_s23, 4  ;;  %s896_s9 = int_to_ptr.vmem [resolvable:$false] %s895_s9 }
  0x6e   : > { %v328_v29 = vld [vmem:[%s1221_s11 + $0x48] sm:$0xff]  ;;  %v384_v31 = vmul.f32 %v1245_v25, %v351_v9  ;;  %v385_v32 = vmul.f32 %v1245_v25, %v352_v10  ;;  %v386_v33 = vmul.f32 %v1245_v25, %v353_v11  ;;  %v387_v34 = vmul.f32 %v1245_v25, %v354_v12  ;;  %v329_v35 = vld [vmem:[%s1221_s11 + $0x50] sm:$0xff]  ;;  %v330_v37 = vld [vmem:[%s1221_s11 + $0x58] sm:$0xff]  ;;  %p893_p9 = pnand %p892_p13, %p1701_p8  ;;  %s897_s20 = scalar_lea.vmem %s896_s9, 8192 }
  0x6f   : > { %v388_v38 = vmul.f32 %v1245_v25, %v355_v16  ;;  %v389_v39 = vmul.f32 %v1245_v25, %v356_v17  ;;  %v390_v40 = vmul.f32 %v1245_v25, %v357_v21  ;;  %v391_v41 = vmul.f32 %v1245_v25, %v358_v26  ;;  %v299_v42 = vld [vmem:[%s1213_s5 + $0x60] sm:$0xff]  ;;  %v300_v44 = vld [vmem:[%s1213_s5 + $0x68] sm:$0xff]  ;;  %v301_v50 = vld [vmem:[%s1213_s5 + $0x70] sm:$0xff]  ;;  %p898_p1 = scmp.lt.s32.totalorder %s1480_s25, %s896_s9  ;;  %p899_p4 = scmp.lt.s32.totalorder %s897_s20, %s891_s14 }
  0x70   : > { %v331_v43 = vld [vmem:[%s1221_s11 + $0x60] sm:$0xff]  ;;  %v1270_v45 = vsub.f32 %v287_v0, %v384_v31  ;;  %v1272_v46 = vsub.f32 %v288_v2, %v385_v32  ;;  %v1274_v47 = vsub.f32 %v289_v4, %v386_v33  ;;  %v1276_v48 = vsub.f32 %v290_v6, %v387_v34  ;;  %v332_v49 = vld [vmem:[%s1221_s11 + $0x68] sm:$0xff]  ;;  %v333_v51 = vld [vmem:[%s1221_s11 + $0x70] sm:$0xff]  ;;  %p894_p10 = pneg %p893_p9 }
  0x71   : > { %v1281_v52 = vsub.f32 %v291_v8, %v388_v38  ;;  %v1283_v53 = vsub.f32 %v292_v14, %v389_v39  ;;  %v1285_v54 = vsub.f32 %v293_v18, %v390_v40  ;;  %v1287_v55 = vsub.f32 %v294_v20, %v391_v41  ;;  %v302_v56 = vld [vmem:[%s1213_s5 + $0x78] sm:$0xff]  ;;  %v1307_v62 = vld [vmem:[%s1213_s5 + $0x80] sm:$0xff]  ;;  %v1319_v4 = vld [vmem:[%s1213_s5 + $0x88] sm:$0xff]  ;;  %p900_p11 = por %p899_p4, %p898_p1 }
  0x72   : > { %v334_v57 = vld [vmem:[%s1221_s11 + $0x78] sm:$0xff]  ;;  %448 = vst [vmem:[%s1292_s26] sm:$0xff] %v1270_v45  ;;  %449 = vst [vmem:[%s1292_s26 + $0x8] sm:$0xff] %v1272_v46  ;;  %v392_v58 = vmul.f32 %v1245_v25, %v359_v27  ;;  %v360_v59 = vsub.f32 %v1248_v28, %v328_v29  ;;  %v361_v60 = vsub.f32 %v1252_v30, %v329_v35  ;;  %v335_v63 = vld [vmem:[%s1221_s11 + $0x80] sm:$0xff] }
  0x73   : > { %450 = vst [vmem:[%s1292_s26 + $0x10] sm:$0xff] %v1274_v47  ;;  %451 = vst [vmem:[%s1292_s26 + $0x18] sm:$0xff] %v1276_v48  ;;  %v362_v61 = vsub.f32 %v1260_v36, %v330_v37  ;;  %v363_v0 = vsub.f32 %v299_v42, %v331_v43  ;;  %v364_v1 = vsub.f32 %v300_v44, %v332_v49  ;;  %v336_v5 = vld [vmem:[%s1221_s11 + $0x88] sm:$0xff]  ;;  %v1323_v6 = vld [vmem:[%s1213_s5 + $0x90] sm:$0xff]  ;;  %p901_p0 = pnand %p900_p11, %p894_p10 }
  0x74   : > { %452 = vst [vmem:[%s1292_s26 + $0x20] sm:$0xff] %v1281_v52  ;;  %453 = vst [vmem:[%s1292_s26 + $0x28] sm:$0xff] %v1283_v53  ;;  %v365_v2 = vsub.f32 %v301_v50, %v333_v51  ;;  %v366_v3 = vsub.f32 %v302_v56, %v334_v57  ;;  %v337_v7 = vld [vmem:[%s1221_s11 + $0x90] sm:$0xff]  ;;  %v1327_v8 = vld [vmem:[%s1213_s5 + $0x98] sm:$0xff]  ;;  %v1329_v9 = vsub.f32 %v295_v23, %v392_v58 }
  0x75   : > { %454 = vst [vmem:[%s1292_s26 + $0x30] sm:$0xff] %v1285_v54  ;;  %455 = vst [vmem:[%s1292_s26 + $0x38] sm:$0xff] %v1287_v55  ;;  %v393_v10 = vmul.f32 %v1245_v25, %v360_v59  ;;  %v394_v11 = vmul.f32 %v1245_v25, %v361_v60  ;;  %v395_v12 = vmul.f32 %v1245_v25, %v362_v61  ;;  %v338_v13 = vld [vmem:[%s1221_s11 + $0x98] sm:$0xff]  ;;  %v1336_v14 = vld [vmem:[%s1213_s5 + $0xa0] sm:$0xff] }
  0x76   : > { %v339_v15 = vld [vmem:[%s1221_s11 + $0xa0] sm:$0xff]  ;;  %v396_v16 = vmul.f32 %v1245_v25, %v363_v0  ;;  %v397_v17 = vmul.f32 %v1245_v25, %v364_v1  ;;  %v398_v18 = vmul.f32 %v1245_v25, %v365_v2  ;;  %v399_v19 = vmul.f32 %v1245_v25, %v366_v3  ;;  %v308_v20 = vld [vmem:[%s1213_s5 + $0xa8] sm:$0xff]  ;;  %v309_v22 = vld [vmem:[%s1213_s5 + $0xb0] sm:$0xff]  ;;  %456 = vst [vmem:[%s1292_s26 + $0x40] sm:$0xff] %v1329_v9 }
  0x77   : > { %v340_v21 = vld [vmem:[%s1221_s11 + $0xa8] sm:$0xff]  ;;  %v1349_v23 = vsub.f32 %v1248_v28, %v393_v10  ;;  %v1352_v24 = vsub.f32 %v1252_v30, %v394_v11  ;;  %v1355_v26 = vsub.f32 %v1260_v36, %v395_v12  ;;  %v367_v27 = vsub.f32 %v1307_v62, %v335_v63  ;;  %v341_v29 = vld [vmem:[%s1221_s11 + $0xb0] sm:$0xff]  ;;  %v310_v31 = vld [vmem:[%s1213_s5 + $0xb8] sm:$0xff] }
  0x78   : > { %v342_v32 = vld [vmem:[%s1221_s11 + $0xb8] sm:$0xff]  ;;  %v1361_v33 = vsub.f32 %v299_v42, %v396_v16  ;;  %v1363_v28 = vsub.f32 %v300_v44, %v397_v17  ;;  %v1365_v30 = vsub.f32 %v301_v50, %v398_v18  ;;  %v1367_v34 = vsub.f32 %v302_v56, %v399_v19  ;;  %v311_v39 = vld [vmem:[%s1213_s5 + $0xc0] sm:$0xff]  ;;  %v312_v49 = vld [vmem:[%s1213_s5 + $0xc8] sm:$0xff] }
  0x79   : > { %457 = vst [vmem:[%s1292_s26 + $0x48] sm:$0xff] %v1349_v23  ;;  %458 = vst [vmem:[%s1292_s26 + $0x50] sm:$0xff] %v1352_v24  ;;  %v400_v35 = vmul.f32 %v1245_v25, %v367_v27  ;;  %v368_v36 = vsub.f32 %v1319_v4, %v336_v5  ;;  %v369_v37 = vsub.f32 %v1323_v6, %v337_v7  ;;  %v343_v40 = vld [vmem:[%s1221_s11 + $0xc0] sm:$0xff]  ;;  %v344_v50 = vld [vmem:[%s1221_s11 + $0xc8] sm:$0xff] }
  0x7a   : > { %459 = vst [vmem:[%s1292_s26 + $0x58] sm:$0xff] %v1355_v26  ;;  %v370_v38 = vsub.f32 %v1327_v8, %v338_v13  ;;  %460 = vst [vmem:[%s1292_s26 + $0x60] sm:$0xff] %v1361_v33  ;;  %v371_v41 = vsub.f32 %v1336_v14, %v339_v15  ;;  %v372_v42 = vsub.f32 %v308_v20, %v340_v21  ;;  %v313_v51 = vld [vmem:[%s1213_s5 + $0xd0] sm:$0xff]  ;;  %v314_v57 = vld [vmem:[%s1213_s5 + $0xd8] sm:$0xff] }
  0x7b   : > { %461 = vst [vmem:[%s1292_s26 + $0x68] sm:$0xff] %v1363_v28  ;;  %462 = vst [vmem:[%s1292_s26 + $0x70] sm:$0xff] %v1365_v30  ;;  %v373_v43 = vsub.f32 %v309_v22, %v341_v29  ;;  %v374_v44 = vsub.f32 %v310_v31, %v342_v32  ;;  %v345_v56 = vld [vmem:[%s1221_s11 + $0xd0] sm:$0xff]  ;;  %v1396_v58 = vsub.f32 %v1307_v62, %v400_v35  ;;  %v346_v63 = vld [vmem:[%s1221_s11 + $0xd8] sm:$0xff] }
  0x7c   : > { %463 = vst [vmem:[%s1292_s26 + $0x78] sm:$0xff] %v1367_v34  ;;  %v401_v59 = vmul.f32 %v1245_v25, %v368_v36  ;;  %v402_v60 = vmul.f32 %v1245_v25, %v369_v37  ;;  %v403_v61 = vmul.f32 %v1245_v25, %v370_v38  ;;  %v315_v0 = vld [vmem:[%s1213_s5 + $0xe0] sm:$0xff]  ;;  %v404_v2 = vmul.f32 %v1245_v25, %v371_v41  ;;  %v316_v7 = vld [vmem:[%s1213_s5 + $0xe8] sm:$0xff]  ;;  %v317_v11 = vld [vmem:[%s1213_s5 + $0xf0] sm:$0xff] }
  0x7d   : > { %v347_v1 = vld [vmem:[%s1221_s11 + $0xe0] sm:$0xff]  ;;  %v405_v3 = vmul.f32 %v1245_v25, %v372_v42  ;;  %v406_v62 = vmul.f32 %v1245_v25, %v373_v43  ;;  %v407_v5 = vmul.f32 %v1245_v25, %v374_v44  ;;  %v348_v10 = vld [vmem:[%s1221_s11 + $0xe8] sm:$0xff]  ;;  %464 = vst [vmem:[%s1292_s26 + $0x80] sm:$0xff] %v1396_v58  ;;  %v375_v16 = vsub.f32 %v311_v39, %v343_v40  ;;  %v349_v17 = vld [vmem:[%s1221_s11 + $0xf0] sm:$0xff] }
  0x7e   : > { %v1416_v12 = vsub.f32 %v1319_v4, %v401_v59  ;;  %v1419_v13 = vsub.f32 %v1323_v6, %v402_v60  ;;  %v1422_v15 = vsub.f32 %v1327_v8, %v403_v61  ;;  %v318_v18 = vld [vmem:[%s1213_s5 + $0xf8] sm:$0xff]  ;;  %v1428_v21 = vsub.f32 %v1336_v14, %v404_v2 }
  0x7f   : > { %v350_v19 = vld [vmem:[%s1221_s11 + $0xf8] sm:$0xff]  ;;  %v1430_v27 = vsub.f32 %v308_v20, %v405_v3  ;;  %v1432_v4 = vsub.f32 %v309_v22, %v406_v62  ;;  %v1434_v6 = vsub.f32 %v310_v31, %v407_v5  ;;  %v408_v8 = vmul.f32 %v1245_v25, %v375_v16 }
  0x80   : > { %465 = vst [vmem:[%s1292_s26 + $0x88] sm:$0xff] %v1416_v12  ;;  %466 = vst [vmem:[%s1292_s26 + $0x90] sm:$0xff] %v1419_v13  ;;  %v376_v29 = vsub.f32 %v312_v49, %v344_v50  ;;  %v377_v32 = vsub.f32 %v313_v51, %v345_v56  ;;  %v378_v14 = vsub.f32 %v314_v57, %v346_v63  ;;  %v1471_v59 = vstv %s1404_s6 }
  0x81   : > { %467 = vst [vmem:[%s1292_s26 + $0x98] sm:$0xff] %v1422_v15  ;;  %468 = vst [vmem:[%s1292_s26 + $0xa0] sm:$0xff] %v1428_v21  ;;  %v379_v20 = vsub.f32 %v315_v0, %v347_v1  ;;  %v380_v22 = vsub.f32 %v316_v7, %v348_v10  ;;  %v381_v31 = vsub.f32 %v317_v11, %v349_v17 }
  0x82   : > { %469 = vst [vmem:[%s1292_s26 + $0xa8] sm:$0xff] %v1430_v27  ;;  %470 = vst [vmem:[%s1292_s26 + $0xb0] sm:$0xff] %v1432_v4  ;;  %v382_v35 = vsub.f32 %v318_v18, %v350_v19  ;;  %v1453_v36 = vsub.f32 %v311_v39, %v408_v8  ;;  %v409_v37 = vmul.f32 %v1245_v25, %v376_v29 }
  0x83   : > { %471 = vst [vmem:[%s1292_s26 + $0xb8] sm:$0xff] %v1434_v6  ;;  %v410_v38 = vmul.f32 %v1245_v25, %v377_v32  ;;  %v411_v40 = vmul.f32 %v1245_v25, %v378_v14  ;;  %v412_v41 = vmul.f32 %v1245_v25, %v379_v20  ;;  %v413_v42 = vmul.f32 %v1245_v25, %v380_v22 }
  0x84   : > { %v414_v43 = vmul.f32 %v1245_v25, %v381_v31  ;;  %v415_v44 = vmul.f32 %v1245_v25, %v382_v35  ;;  %472 = vst [vmem:[%s1292_s26 + $0xc0] sm:$0xff] %v1453_v36  ;;  %v1464_v39 = vsub.f32 %v312_v49, %v409_v37  ;;  %v481_v60 = vmul.f32 %v1471_v59, %v1270_v45 }
  0x85   : > { %v1466_v50 = vsub.f32 %v313_v51, %v410_v38  ;;  %v1468_v56 = vsub.f32 %v314_v57, %v411_v40  ;;  %v1482_v25 = vsub.f32 %v315_v0, %v412_v41  ;;  %v1484_v49 = vsub.f32 %v316_v7, %v413_v42 }
  0x86   : > { %v1486_v51 = vsub.f32 %v317_v11, %v414_v43  ;;  %v1488_v57 = vsub.f32 %v318_v18, %v415_v44  ;;  %473 = vst [vmem:[%s1292_s26 + $0xc8] sm:$0xff] %v1464_v39  ;;  %v482_v61 = vmul.f32 %v1471_v59, %v1272_v46  ;;  %v483_v63 = vmul.f32 %v1471_v59, %v1274_v47 }
  0x87   : > { %474 = vst [vmem:[%s1292_s26 + $0xd0] sm:$0xff] %v1466_v50  ;;  %475 = vst [vmem:[%s1292_s26 + $0xd8] sm:$0xff] %v1468_v56  ;;  %v484_v0 = vmul.f32 %v1471_v59, %v1276_v48  ;;  %v485_v45 = vmul.f32 %v1471_v59, %v1281_v52  ;;  %v486_v46 = vmul.f32 %v1471_v59, %v1283_v53 }
  0x88   : > { %476 = vst [vmem:[%s1292_s26 + $0xe0] sm:$0xff] %v1482_v25  ;;  %477 = vst [vmem:[%s1292_s26 + $0xe8] sm:$0xff] %v1484_v49  ;;  %v487_v47 = vmul.f32 %v1471_v59, %v1285_v54  ;;  %v488_v48 = vmul.f32 %v1471_v59, %v1287_v55  ;;  %v489_v52 = vmul.f32 %v1471_v59, %v1329_v9 }
  0x89   : > { %478 = vst [vmem:[%s1292_s26 + $0xf0] sm:$0xff] %v1486_v51  ;;  %479 = vst [vmem:[%s1292_s26 + $0xf8] sm:$0xff] %v1488_v57  ;;  %v490_v53 = vmul.f32 %v1471_v59, %v1349_v23  ;;  %v491_v54 = vmul.f32 %v1471_v59, %v1352_v24  ;;  %v492_v55 = vmul.f32 %v1471_v59, %v1355_v26 }
  0x8a   : > { %513 = vst [vmem:[%s1521_s8] sm:$0xff] %v481_v60  ;;  %514 = vst [vmem:[%s1521_s8 + $0x8] sm:$0xff] %v482_v61 }
  0x8b   : > { %515 = vst [vmem:[%s1521_s8 + $0x10] sm:$0xff] %v483_v63  ;;  %516 = vst [vmem:[%s1521_s8 + $0x18] sm:$0xff] %v484_v0 }
  0x8c   : > { %904 = shalt.err (!%p901_p0)
}
  0x8d   : > { %s905_s5 = scalar_lea.hbm %s1478_s12, 4096  ;;  %s909_s22 = scalar_lea.hbm %s1684_s3, 8192 }
  0x8e   : > { %p906_p6 = scmp.ne.s32.totalorder %s1478_s12, %s905_s5  ;;  %p910_p5 = scmp.lt.s32.totalorder %s1478_s12, %s1684_s3 }
  0x8f   : > { %p911_p2 = scmp.lt.s32.totalorder %s909_s22, %s905_s5 }
  0x90   : > { %p907_p12 = pnand %p906_p6, %p1701_p8 }
  0x91   : > { %p912_p3 = por %p911_p2, %p910_p5 }
  0x92   : > { %p908_p7 = pneg %p907_p12 }
  0x94   : > { %p913_p13 = pnand %p912_p3, %p908_p7 }
  0x96   : > { %916 = shalt.err (!%p913_p13)
}
  0x97   : > { %s1001_s13 = smov 128   ;;  %s1002_s30 = smov 8   ;;  %517 = vst [vmem:[%s1521_s8 + $0x20] sm:$0xff] %v485_v45  ;;  %518 = vst [vmem:[%s1521_s8 + $0x28] sm:$0xff] %v486_v46  ;;  %v493_v9 = vmul.f32 %v1471_v59, %v1361_v33  ;;  %v494_v23 = vmul.f32 %v1471_v59, %v1363_v28  ;;  %v495_v24 = vmul.f32 %v1471_v59, %v1365_v30 }
  0x98   : > { %757 = dma.vmem_to_hbm [thread:$0]  (%p1701_p8), %s1480_s25, 4096, %s1478_s12, %s546_s10, %s1001_s13, %s1001_s13, %s1002_s30   ;;  %v496_v26 = vmul.f32 %v1471_v59, %v1367_v34  ;;  %v497_v33 = vmul.f32 %v1471_v59, %v1396_v58  ;;  %v498_v28 = vmul.f32 %v1471_v59, %v1416_v12  ;;  %v499_v30 = vmul.f32 %v1471_v59, %v1419_v13 }
  0x99   : > { %519 = vst [vmem:[%s1521_s8 + $0x30] sm:$0xff] %v487_v47  ;;  %520 = vst [vmem:[%s1521_s8 + $0x38] sm:$0xff] %v488_v48  ;;  %v500_v34 = vmul.f32 %v1471_v59, %v1422_v15  ;;  %s580_s25 = sshll.u32 %s1521_s8, 4  ;;  %v501_v58 = vmul.f32 %v1471_v59, %v1428_v21  ;;  %v502_v1 = vmul.f32 %v1471_v59, %v1430_v27  ;;  %s1627_s14 = scalar_lea.hbm %s1685_s4, %s747_s7  ;;  %s1629_s25 = int_to_ptr.vmem [resolvable:$true] %s580_s25 }
  0x9a   : > { %521 = vst [vmem:[%s1521_s8 + $0x40] sm:$0xff] %v489_v52  ;;  %522 = vst [vmem:[%s1521_s8 + $0x48] sm:$0xff] %v490_v53  ;;  %v503_v2 = vmul.f32 %v1471_v59, %v1432_v4  ;;  %v504_v3 = vmul.f32 %v1471_v59, %v1434_v6  ;;  %v505_v62 = vmul.f32 %v1471_v59, %v1453_v36  ;;  %s551_s23 = scalar_lea.sflag [#allocation11], %s1206_s0  ;;  %s917_s19 = scalar_lea.vmem %s1629_s25, 4096 }
  0x9b   : > { %523 = vst [vmem:[%s1521_s8 + $0x50] sm:$0xff] %v491_v54  ;;  %524 = vst [vmem:[%s1521_s8 + $0x58] sm:$0xff] %v492_v55  ;;  %v506_v5 = vmul.f32 %v1471_v59, %v1464_v39  ;;  %v507_v7 = vmul.f32 %v1471_v59, %v1466_v50  ;;  %v508_v10 = vmul.f32 %v1471_v59, %v1468_v56  ;;  %p918_p9 = scmp.ne.s32.totalorder %s1629_s25, %s917_s19  ;;  %s1003_s7 = smov [#allocation10]  }
  0x9c   : > { %525 = vst [vmem:[%s1521_s8 + $0x60] sm:$0xff] %v493_v9  ;;  %526 = vst [vmem:[%s1521_s8 + $0x68] sm:$0xff] %v494_v23  ;;  %v509_v11 = vmul.f32 %v1471_v59, %v1482_v25  ;;  %v510_v12 = vmul.f32 %v1471_v59, %v1484_v49  ;;  %v511_v13 = vmul.f32 %v1471_v59, %v1486_v51  ;;  %s921_s9 = sshll.u32 %s1003_s7, 4  ;;  %s922_s9 = int_to_ptr.vmem [resolvable:$false] %s921_s9 }
  0x9d   : > { %527 = vst [vmem:[%s1521_s8 + $0x70] sm:$0xff] %v495_v24  ;;  %528 = vst [vmem:[%s1521_s8 + $0x78] sm:$0xff] %v496_v26  ;;  %v512_v15 = vmul.f32 %v1471_v59, %v1488_v57  ;;  %p919_p10 = pnand %p918_p9, %p1701_p8  ;;  %s923_s20 = scalar_lea.vmem %s922_s9, 8192 }
  0x9e   : > { %529 = vst [vmem:[%s1521_s8 + $0x80] sm:$0xff] %v497_v33  ;;  %530 = vst [vmem:[%s1521_s8 + $0x88] sm:$0xff] %v498_v28  ;;  %p924_p4 = scmp.lt.s32.totalorder %s1629_s25, %s922_s9  ;;  %p925_p11 = scmp.lt.s32.totalorder %s923_s20, %s917_s19 }
  0x9f   : > { %531 = vst [vmem:[%s1521_s8 + $0x90] sm:$0xff] %v499_v30  ;;  %532 = vst [vmem:[%s1521_s8 + $0x98] sm:$0xff] %v500_v34  ;;  %p920_p1 = pneg %p919_p10 }
  0xa0   : > { %533 = vst [vmem:[%s1521_s8 + $0xa0] sm:$0xff] %v501_v58  ;;  %534 = vst [vmem:[%s1521_s8 + $0xa8] sm:$0xff] %v502_v1  ;;  %p926_p0 = por %p925_p11, %p924_p4 }
  0xa1   : > { %535 = vst [vmem:[%s1521_s8 + $0xb0] sm:$0xff] %v503_v2  ;;  %536 = vst [vmem:[%s1521_s8 + $0xb8] sm:$0xff] %v504_v3 }
  0xa2   : > { %537 = vst [vmem:[%s1521_s8 + $0xc0] sm:$0xff] %v505_v62  ;;  %538 = vst [vmem:[%s1521_s8 + $0xc8] sm:$0xff] %v506_v5  ;;  %p927_p6 = pnand %p926_p0, %p920_p1 }
  0xa3   : > { %539 = vst [vmem:[%s1521_s8 + $0xd0] sm:$0xff] %v507_v7  ;;  %540 = vst [vmem:[%s1521_s8 + $0xd8] sm:$0xff] %v508_v10 }
  0xa4   : > { %541 = vst [vmem:[%s1521_s8 + $0xe0] sm:$0xff] %v509_v11  ;;  %542 = vst [vmem:[%s1521_s8 + $0xe8] sm:$0xff] %v510_v12 }
  0xa5   : > { %543 = vst [vmem:[%s1521_s8 + $0xf0] sm:$0xff] %v511_v13  ;;  %544 = vst [vmem:[%s1521_s8 + $0xf8] sm:$0xff] %v512_v15 }
  0xa6   : > { %930 = shalt.err (!%p927_p6)
}
  0xa7   : > { %s931_s8 = scalar_lea.hbm %s1627_s14, 4096  ;;  %s935_s29 = scalar_lea.hbm %s1685_s4, 8192 }
  0xa8   : > { %p932_p12 = scmp.ne.s32.totalorder %s1627_s14, %s931_s8  ;;  %p936_p2 = scmp.lt.s32.totalorder %s1627_s14, %s1685_s4 }
  0xa9   : > { %p937_p3 = scmp.lt.s32.totalorder %s935_s29, %s931_s8 }
  0xaa   : > { %p933_p7 = pnand %p932_p12, %p1701_p8 }
  0xab   : > { %p938_p13 = por %p937_p3, %p936_p2 }
  0xac   : > { %p934_p5 = pneg %p933_p7 }
  0xae   : > { %p939_p9 = pnand %p938_p13, %p934_p5 }
  0xb0   : > { %942 = shalt.err (!%p939_p9)
}
  0xb1   : > { %758 = dma.vmem_to_hbm [thread:$0]  (%p1701_p8), %s1629_s25, 4096, %s1627_s14, %s551_s23, %s1001_s13, %s1001_s13, %s1002_s30  }
  0xb2 PF: > { %s595_s26 = sand.u32 1, %s981_s15   ;;  %p1702_p10 = scmp.ne.s32.totalorder %s1693_s28, 0 }
  0xb3   : > { %p1703_p1 = scmp.ge.s32.totalorder %s993_s18, 2  ;;  %s596_s6 = scalar_lea.sflag [#allocation4], %s595_s26 }
  0xb5   : > { %p773_p4 = pnand %p1703_p1, %p1702_p10 }
  0xb7   : > { %p774_p11 = pneg %p773_p4 }
  0xb9   : > { %972 = dma.done.wait (%p774_p11), %s596_s6, 4096  }
  0xba   : > { %974 = vsyncadd (%p774_p11), %s596_s6, 4294963200  ;;  %s605_s12 = scalar_lea.sflag [#allocation11], %s595_s26 }
  0xbb   : > { %976 = dma.done.wait (%p774_p11), %s605_s12, 4096  }
  0xbc   : > { %978 = vsyncadd (%p774_p11), %s605_s12, 4294963200  ;;  %p25_p8 = scmp.ge.s32.totalorder %s1054_s21, 4   ;;  %s1704_s15 = smov %s985_s16 }
  0xbd   : > { %s1705_s16 = smov %s989_s17  ;;  %s1706_s17 = smov %s1066_s24 }
  0xbe   : > { %s1707_s18 = smov %s1054_s21  ;;  %27 = sbr.rel (!%p25_p8) target bundleno = 12 (0xc), region = 112 }
  0xc3   :  { %610 = vsyncpa [#allocation3], 1 }
  0xc4   :  { %612 = vsyncpa [#allocation3 + $0x1], 1 }
  0xc5   :  { %613 = vsyncpa [#allocation8], 1 }
  0xc6   :  { %615 = vsyncpa [#allocation8 + $0x1], 1 }
  0xc7   :  { %616 = vsyncpa [#allocation4], 1 }
  0xc8   :  { %618 = vsyncpa [#allocation4 + $0x1], 1 }
  0xc9   :  { %619 = vsyncpa [#allocation11], 1 }
  0xca   :  { %621 = vsyncpa [#allocation11 + $0x1], 1 }
  0xcb   :  { %622 = vsyncpa [#allocation5], 1 }
  0xcc   :  { %624 = vsyncpa [#allocation5 + $0x1], 1 }

</bundles_post_ra>
